<compile_context>
chip_gen: v7x
topology: tpu7x:2x2x1
jax: 0.10.0
libtpu: 0.0.40
codegen_flags: <defaults>
</compile_context>

<pallas_src>
import jax
import jax.numpy as jnp
from jax.experimental import pallas as pl
from jax.experimental.pallas import tpu as pltpu

# --- synthetic config (deterministic, yolact-style defaults) -----------------
MEANS = (103.94, 116.78, 123.68)   # cfg.data.means   (RGB)
STD = (57.38, 57.12, 58.40)        # cfg.data.std     (RGB)
INPUT_SIZE = 32                    # cfg.data.input_size (small synthetic size)
# cfg.data.preserve_aspect_ratio = False
# cfg.backbone.transform.normalize = True, channel_order = 'RGB'


def _bilinear_weight_matrix(in_size: int, out_size: int) -> jnp.ndarray:
    """Exact PyTorch F.interpolate(mode='bilinear', align_corners=False) weights."""
    scale = in_size / out_size
    i = jnp.arange(out_size, dtype=jnp.float32)
    src = scale * (i + 0.5) - 0.5
    src = jnp.maximum(src, 0.0)                      # torch clamps negative src to 0
    i0 = jnp.floor(src).astype(jnp.int32)
    i1 = jnp.minimum(i0 + 1, in_size - 1)
    frac = src - i0.astype(jnp.float32)
    oh0 = jax.nn.one_hot(i0, in_size, dtype=jnp.float32)
    oh1 = jax.nn.one_hot(i1, in_size, dtype=jnp.float32)
    return (1.0 - frac)[:, None] * oh0 + frac[:, None] * oh1   # (out, in)


def _fast_base_transform_kernel(x_ref, wwt_ref, whc_ref, bias_ref, out_ref):
    # x_ref   : (C*H, W)    one NCHW image, rows ordered (c, h)
    # wwt_ref : (W, S)      pre-transposed width-interp weights  (Ww^T)
    # whc_ref : (C*S, C*H)  kron(P_bgr * 1/std, Wh): H-interp + BGR swap + scale
    # bias_ref: (C*S, 1)    -mean/std per output row block (BGR order)
    # out_ref : (C*S, S)    NCHW(BGR) result for this image, rows (c_bgr, oh)
    y = jnp.dot(x_ref[...], wwt_ref[...], preferred_element_type=jnp.float32)   # (C*H, S)
    z = jnp.dot(whc_ref[...], y, preferred_element_type=jnp.float32)            # (C*S, S)
    out_ref[...] = z + bias_ref[...]                                            # fused affine norm


@jax.jit
def fast_base_transform(img_nhwc: jnp.ndarray) -> jnp.ndarray:
    B, H, W, C = img_nhwc.shape
    assert C == 3, "FastBaseTransform expects 3-channel images"
    S = INPUT_SIZE

    # NHWC -> NCHW, flattened to (B, C*H, W) so all channels share one matmul.
    x = jnp.transpose(img_nhwc, (0, 3, 1, 2)).astype(jnp.float32).reshape(B, C * H, W)

    # Interpolation weights (built once in plain JAX glue).
    wh = _bilinear_weight_matrix(H, S)                 # (S, H)
    wwt = _bilinear_weight_matrix(W, S).T              # (W, S)  -- pre-transposed

    mean = jnp.asarray(MEANS, jnp.float32)
    std = jnp.asarray(STD, jnp.float32)
    p_bgr = jnp.flip(jnp.eye(C, dtype=jnp.float32), axis=1)   # out c' <- in (2 - c')
    inv_std_bgr = (1.0 / std)[::-1]
    # H-interp weights, fused over channels, with BGR reorder + 1/std folded in.
    whc = jnp.kron(p_bgr * inv_std_bgr[:, None], wh)          # (C*S, C*H)
    bias = jnp.repeat((-mean / std)[::-1], S)[:, None]        # (C*S, 1)

    out = pl.pallas_call(
        _fast_base_transform_kernel,
        out_shape=jax.ShapeDtypeStruct((B, C * S, S), jnp.float32),
        grid=(B,),
        in_specs=[
            pl.BlockSpec((None, C * H, W), lambda b: (b, 0, 0)),   # one image (all channels)
            pl.BlockSpec((W, S), lambda b: (0, 0)),                # Ww^T      (grid-invariant)
            pl.BlockSpec((C * S, C * H), lambda b: (0, 0)),        # Whc       (grid-invariant)
            pl.BlockSpec((C * S, 1), lambda b: (0, 0)),            # bias      (grid-invariant)
        ],
        out_specs=pl.BlockSpec((None, C * S, S), lambda b: (b, 0, 0)),
        compiler_params=pltpu.CompilerParams(
            dimension_semantics=("parallel",)),                    # batch splits across TCs (v7x)
    )(x, wwt, whc, bias)

    # (B, C*S, S) -> (B, C, S, S): contiguous reshape, no data movement.
    return out.reshape(B, C, S, S)


def _reference(img_nhwc: jnp.ndarray) -> jnp.ndarray:
    """Pure-JAX reference with the torch module's math (for a sanity check)."""
    B, H, W, C = img_nhwc.shape
    S = INPUT_SIZE
    hp = jax.lax.Precision.HIGHEST
    img = jnp.transpose(img_nhwc, (0, 3, 1, 2)).astype(jnp.float32)
    wh = _bilinear_weight_matrix(H, S)
    ww = _bilinear_weight_matrix(W, S)
    tmp = jnp.einsum('oh,bchw->bcow', wh, img, precision=hp)
    res = jnp.einsum('pw,bcow->bcop', ww, tmp, precision=hp)
    mean = jnp.asarray(MEANS, jnp.float32)[None, :, None, None]
    std = jnp.asarray(STD, jnp.float32)[None, :, None, None]
    res = (res - mean) / std
    return res[:, ::-1]          # RGB -> BGR


if __name__ == "__main__":
    key = jax.random.PRNGKey(0)
    B, H, W, C = 2, 16, 16, 3
    # Pixel-like values in [0, 255).
    img = jax.random.uniform(key, (B, H, W, C), dtype=jnp.float32) * 255.0

    out = fast_base_transform(img)
    out = jax.block_until_ready(out)

    ref = _reference(img)
    assert out.shape == (B, 3, INPUT_SIZE, INPUT_SIZE)
    # Tolerance covers MXU f32 pass decomposition / contraction-order differences
    # vs. the HIGHEST-precision XLA reference; real bugs produce O(0.1-1) errors.
    assert jnp.allclose(out, ref, atol=1e-3, rtol=1e-3), "kernel mismatch vs reference"

    print("KERNEL_OK")
</pallas_src>

<mosaic_0001>
module attributes {stable_mosaic.version = 11 : i64} {
  func.func @_fast_base_transform_kernel(%arg0: i32, %arg1: memref<1x48x16xf32, #tpu.memory_space<vmem>>, %arg2: memref<16x32xf32, #tpu.memory_space<vmem>>, %arg3: memref<96x48xf32, #tpu.memory_space<vmem>>, %arg4: memref<96x1xf32, #tpu.memory_space<vmem>>, %arg5: memref<1x96x32xf32, #tpu.memory_space<vmem>>) attributes {dimension_semantics = [#tpu.dimension_semantics<parallel>], iteration_bounds = array<i64: 2>, scalar_prefetch = 0 : i64, scratch_operands = 0 : i64, tpu.core_type = #tpu.core_type<tc>, window_params = [{transform_indices = @transform_0, window_bounds = array<i64: 1, 48, 16>}, {pipeline_mode = #tpu.pipeline_mode<synchronous>, transform_indices = @transform_1, window_bounds = array<i64: 16, 32>}, {pipeline_mode = #tpu.pipeline_mode<synchronous>, transform_indices = @transform_2, window_bounds = array<i64: 96, 48>}, {pipeline_mode = #tpu.pipeline_mode<synchronous>, transform_indices = @transform_3, window_bounds = array<i64: 96, 1>}, {transform_indices = @transform_4, window_bounds = array<i64: 1, 96, 32>}]} {
    %c0 = arith.constant 0 : index
    %c0_0 = arith.constant 0 : index
    %c0_1 = arith.constant 0 : index
    %0 = vector.load %arg1[%c0, %c0_0, %c0_1] : memref<1x48x16xf32, #tpu.memory_space<vmem>>, vector<1x48x16xf32>
    %1 = vector.shape_cast %0 : vector<1x48x16xf32> to vector<48x16xf32>
    %c0_2 = arith.constant 0 : index
    %c0_3 = arith.constant 0 : index
    %2 = vector.load %arg2[%c0_2, %c0_3] : memref<16x32xf32, #tpu.memory_space<vmem>>, vector<16x32xf32>
    %cst = arith.constant dense<0.000000e+00> : vector<48x32xf32>
    %3 = tpu.matmul %1, %2, %cst {dimension_numbers = #tpu.dot_dimension_numbers<[1], [0], [0], [1], [0, 0, 1, 1], [], []>} : vector<48x16xf32>, vector<16x32xf32>, vector<48x32xf32> -> vector<48x32xf32>
    %c0_4 = arith.constant 0 : index
    %c0_5 = arith.constant 0 : index
    %4 = vector.load %arg3[%c0_4, %c0_5] : memref<96x48xf32, #tpu.memory_space<vmem>>, vector<96x48xf32>
    %cst_6 = arith.constant dense<0.000000e+00> : vector<96x32xf32>
    %5 = tpu.matmul %4, %3, %cst_6 {dimension_numbers = #tpu.dot_dimension_numbers<[1], [0], [0], [1], [0, 0, 1, 1], [], []>} : vector<96x48xf32>, vector<48x32xf32>, vector<96x32xf32> -> vector<96x32xf32>
    %c0_7 = arith.constant 0 : index
    %c0_8 = arith.constant 0 : index
    %6 = vector.load %arg4[%c0_7, %c0_8] : memref<96x1xf32, #tpu.memory_space<vmem>>, vector<96x1xf32>
    %7 = vector.broadcast %6 : vector<96x1xf32> to vector<96x32xf32>
    %8 = arith.addf %5, %7 : vector<96x32xf32>
    %c0_9 = arith.constant 0 : index
    %c0_10 = arith.constant 0 : index
    %c0_11 = arith.constant 0 : index
    %9 = vector.load %arg5[%c0_9, %c0_10, %c0_11] : memref<1x96x32xf32, #tpu.memory_space<vmem>>, vector<1x96x32xf32>
    %10 = vector.shape_cast %9 : vector<1x96x32xf32> to vector<96x32xf32>
    %11 = vector.shape_cast %8 : vector<96x32xf32> to vector<1x96x32xf32>
    tpu.vector_store %arg5[%c0_9, %c0_10, %c0_11], %11 {strides = array<i32>} : memref<1x96x32xf32, #tpu.memory_space<vmem>>, vector<1x96x32xf32>,
    return
  }
  func.func @transform_0(%arg0: i32) -> (i32, i32, i32) {
    %c0_i32 = arith.constant 0 : i32
    %c0_i32_0 = arith.constant 0 : i32
    %c0_i32_1 = arith.constant 0 : i32
    return %arg0, %c0_i32, %c0_i32_0 : i32, i32, i32
  }
  func.func @transform_1(%arg0: i32) -> (i32, i32) {
    %c0_i32 = arith.constant 0 : i32
    %c0_i32_0 = arith.constant 0 : i32
    %c0_i32_1 = arith.constant 0 : i32
    return %c0_i32, %c0_i32_0 : i32, i32
  }
  func.func @transform_2(%arg0: i32) -> (i32, i32) {
    %c0_i32 = arith.constant 0 : i32
    %c0_i32_0 = arith.constant 0 : i32
    %c0_i32_1 = arith.constant 0 : i32
    return %c0_i32, %c0_i32_0 : i32, i32
  }
  func.func @transform_3(%arg0: i32) -> (i32, i32) {
    %c0_i32 = arith.constant 0 : i32
    %c0_i32_0 = arith.constant 0 : i32
    %c0_i32_1 = arith.constant 0 : i32
    return %c0_i32, %c0_i32_0 : i32, i32
  }
  func.func @transform_4(%arg0: i32) -> (i32, i32, i32) {
    %c0_i32 = arith.constant 0 : i32
    %c0_i32_0 = arith.constant 0 : i32
    %c0_i32_1 = arith.constant 0 : i32
    return %arg0, %c0_i32, %c0_i32_0 : i32, i32, i32
  }
}

</mosaic_0001>

<bundles_post_ra>
// kernel: fast_base_transform.1
= control target key start
LH: loop header
LB: loop body
LE: loop exit
PB: predicated region body
PF: predicated region fallthrough
CT: control target
= control target key end

     0   :  { %9 = vsyncpa [#allocation3], 0  ;;  %s1134_s0 = inlined_call_operand.vmem [shape: f32[2,48,16], index: 0, kind: input, shape index: {}]   ;;  %s1135_s1 = inlined_call_operand.vmem [shape: f32[16,32], index: 1, kind: input, shape index: {}]   ;;  %s1136_s2 = inlined_call_operand.vmem [shape: f32[96,48], index: 2, kind: input, shape index: {}]   ;;  %s1137_s3 = inlined_call_operand.vmem [shape: f32[96,1], index: 3, kind: input, shape index: {}]   ;;  %s1138_s4 = inlined_call_operand.hbm [shape: f32[2,96,32], index: 4, kind: output, shape index: {}]  }
   0x1   :  { %11 = vsyncpa [#allocation3 + $0x1], 0  ;;  %s910_s15 = smov 0   ;;  %s912_s16 = smov 0  }
   0x2   :  { %s914_s17 = smov 0   ;;  %s916_s18 = smov 0  }
   0x3 LB: > { %s931_s19 = sadd.s32 4294967295, %s879_s18   ;;  %s653_s20 = sadd.s32 4294967294, %s879_s18   ;;  %s879_s18 = sphi %s916_s18, %s1144_s18   ;;  %s875_s17 = sphi %s914_s17, %s1143_s17   ;;  %s871_s16 = sphi %s912_s16, %s1142_s16   ;;  %s867_s15 = sphi %s910_s15, %s1141_s15  }
   0x4   : > { %s935_s21 = sadd.s32 1, %s879_s18   ;;  %s113_s22 = sadd.s32 1, %s875_s17 }
   0x5   : > { %s110_s23 = ssub.s32 %s879_s18, %s935_s21  ;;  %p123_p0 = scmp.ne.s32.totalorder %s875_s17, %s871_s16 }
   0x6   : > { %p111_p1 = scmp.eq.s32.totalorder %s110_s23, 0  ;;  %p124_p2 = scmp.eq.s32.totalorder %s931_s19, 1 }
   0x7   : > { %p129_p3 = scmp.ne.s32.totalorder %s871_s16, %s867_s15  ;;  %p130_p4 = scmp.eq.s32.totalorder %s653_s20, 1 }
   0x8   : > { %s946_s24 = scalar_select %p111_p1, %s875_s17, %s113_s22  }
   0x9   : > { %p948_p5 = por %p124_p2, %p123_p0  ;;  %p952_p6 = por %p130_p4, %p129_p3 }
   0xa   : > { %p656_p7 = scmp.ge.s32.totalorder %s879_s18, 1  ;;  %p165_p8 = scmp.lt.s32.totalorder %s879_s18, 3 }
   0xc   : > { %p166_p9 = pnand %p656_p7, %p165_p8 }
   0xd   : > { %v202_v0 = vld [vmem:[%s1135_s1] sm:$0xff] (!%p166_p9)  ;;  %v203_v1 = vld [vmem:[%s1135_s1 + $0x8] sm:$0xff] (!%p166_p9)  ;;  %p191_p10 = scmp.lt.s32.totalorder (!%p166_p9), %s931_s19, 1  ;;  %vm204_vm0 = vcmask (!%p166_p9), 130048   ;;  %vm402_vm1 = vcmask (!%p166_p9), 392192   ;;  %v332_v11 = vld [vmem:[%s1137_s3 + $0x10] sm:$0xff] (!%p166_p9) }
   0xe   : > { %169 = sbr.rel (%p166_p9) target bundleno = 497 (0x1f1), region = 36  ;;  %v748_v2 = vpack.c.bf16 (!%p166_p9), %v203_v1, %v202_v0  ;;  %v318_v9 = vld [vmem:[%s1136_s2] sm:$0xff] (!%p166_p9)  ;;  %v881_v13 = vmov (!%p166_p9), 0   ;;  %v333_v14 = vld [vmem:[%s1137_s3 + $0x18] sm:$0xff] (!%p166_p9)  ;;  %v331_v15 = vld [vmem:[%s1137_s3 + $0x8] sm:$0xff] (!%p166_p9)  ;;  %s188_s7 = sand.u32 (!%p166_p9), 1, %s871_s16  }
   0xf   : > { %v322_v10 = vld [vmem:[%s1136_s2 + $0x20] sm:$0xff] (!%p166_p9)  ;;  %816 = vset.pattern.permute.xlu1 (!%p166_p9), %v881_v13  ;;  %815 = vset.pattern.permute.xlu0 (!%p166_p9), %v881_v13  ;;  %v335_v16 = vld [vmem:[%s1137_s3 + $0x28] sm:$0xff] (!%p166_p9)  ;;  %v337_v18 = vld [vmem:[%s1137_s3 + $0x38] sm:$0xff] (!%p166_p9)  ;;  %s770_s8 = smul.u32 (!%p166_p9), 96, %s188_s7  ;;  %vm564_vm2 = vcmask (!%p166_p9), 261120   ;;  %s882_s22 = smov (!%p166_p9), [#allocation2]  }
  0x10   : > { %749 = vmatprep.subr.bf16.mxu0 (!%p166_p9), %v748_v2  ;;  %736 = vmatprep.mubr.msk.f32.mxu1 (!%p166_p9), %vm402_vm1, %v322_v10  ;;  %v330_v12 = vld [vmem:[%s1137_s3] sm:$0xff] (!%p166_p9)  ;;  %v336_v19 = vld [vmem:[%s1137_s3 + $0x30] sm:$0xff] (!%p166_p9)  ;;  %v339_v20 = vld [vmem:[%s1137_s3 + $0x48] sm:$0xff] (!%p166_p9)  ;;  %s772_s10 = smul.u32 (!%p166_p9), 1536, %s931_s19  ;;  %s821_s23 = sshll.u32 (!%p166_p9), %s882_s22, 4  ;;  %s822_s23 = int_to_ptr.vmem [resolvable:$false] %s821_s23 }
  0x11   : > { %751 = vmatpush3.bf16.msra.mxu0 (!%p166_p9), %v748_v2  ;;  %354 = vperm.xlu1 (!%p166_p9), %816, %v332_v11   ;;  %v334_v17 = vld [vmem:[%s1137_s3 + $0x20] sm:$0xff] (!%p166_p9)  ;;  %v341_v22 = vld [vmem:[%s1137_s3 + $0x58] sm:$0xff] (!%p166_p9)  ;;  %v340_v23 = vld [vmem:[%s1137_s3 + $0x50] sm:$0xff] (!%p166_p9)  ;;  %s823_s27 = scalar_lea.vmem (!%p166_p9), %s822_s23, 3072 }
  0x12   : > { %344 = vperm.xlu0 (!%p166_p9), %815, %v330_v12   ;;  %v338_v21 = vld [vmem:[%s1137_s3 + $0x40] sm:$0xff] (!%p166_p9)  ;;  %v319_v33 = vld [vmem:[%s1136_s2 + $0x8] sm:$0xff] (!%p166_p9)  ;;  %v320_v35 = vld [vmem:[%s1136_s2 + $0x10] sm:$0xff] (!%p166_p9)  ;;  %s1083_s14 = scalar_lea.hbm (!%p166_p9), %s1138_s4, %s772_s10 }
  0x13   : > { %v323_v34 = vld [vmem:[%s1136_s2 + $0x28] sm:$0xff] (!%p166_p9)  ;;  %v324_v36 = vld [vmem:[%s1136_s2 + $0x30] sm:$0xff] (!%p166_p9)  ;;  %v321_v37 = vld [vmem:[%s1136_s2 + $0x18] sm:$0xff] (!%p166_p9) }
  0x14   : > { %v325_v38 = vld [vmem:[%s1136_s2 + $0x38] sm:$0xff] (!%p166_p9)  ;;  %v326_v39 = vld [vmem:[%s1136_s2 + $0x40] sm:$0xff] (!%p166_p9)  ;;  %v327_v40 = vld [vmem:[%s1136_s2 + $0x48] sm:$0xff] (!%p166_p9) }
  0x15   : > { %s192_s5 = scalar_select %p191_p10, %s931_s19, 1  ;;  %359 = vperm.xlu1 %816, %v333_v14   ;;  %v328_v41 = vld [vmem:[%s1136_s2 + $0x50] sm:$0xff]  ;;  %v329_v42 = vld [vmem:[%s1136_s2 + $0x58] sm:$0xff] }
  0x16   : > { %349 = vperm.xlu0 %815, %v331_v15   ;;  %s1093_s19 = scalar_lea.sflag [#allocation3], %s188_s7 }
  0x17   : > { %s771_s6 = smul.u32 48, %s192_s5 }
  0x19   : > { %s195_s9 = scalar_lea.vmem %s1134_s0, %s771_s6  ;;  %369 = vperm.xlu1 %816, %v335_v16  }
  0x1a   : > { %v196_v3 = vld [vmem:[%s195_s9] sm:$0xff]  ;;  %v197_v4 = vld [vmem:[%s195_s9 + $0x8] sm:$0xff]  ;;  %v198_v5 = vld [vmem:[%s195_s9 + $0x10] sm:$0xff]  ;;  %364 = vperm.xlu0 %815, %v334_v17  }
  0x1b   : > { %709 = vmatprep.mubr.msk.f32.mxu0 %vm204_vm0, %v196_v3  ;;  %v199_v6 = vld [vmem:[%s195_s9 + $0x18] sm:$0xff]  ;;  %v200_v7 = vld [vmem:[%s195_s9 + $0x20] sm:$0xff]  ;;  %v201_v8 = vld [vmem:[%s195_s9 + $0x28] sm:$0xff]  ;;  %s1056_s9 = scalar_lea.vmem [#allocation2], %s770_s8 }
  0x1c   : > { %710 = vmatmul.mubr.msk.f32.vlgmr.msra.gmra.mrb[0].mxu0 %vm204_vm0, %v197_v4  ;;  %s591_s11 = sshll.u32 %s1056_s9, 4  ;;  %s1085_s11 = int_to_ptr.vmem [resolvable:$true] %s591_s11 }
  0x1d   : > { %712 = vmatprep.mubr.msk.f32.mxu0 %vm204_vm0, %v198_v5  ;;  %379 = vperm.xlu1 %816, %v337_v18   ;;  %s817_s20 = scalar_lea.vmem %s1085_s11, 1536  ;;  %p824_p0 = scmp.lt.s32.totalorder %s1085_s11, %s822_s23 }
  0x1e   : > { %374 = vperm.xlu0 %815, %v336_v19   ;;  %p818_p11 = scmp.ne.s32.totalorder %s1085_s11, %s817_s20  ;;  %p825_p1 = scmp.lt.s32.totalorder %s823_s27, %s817_s20 }
  0x20   : > { %713 = vmatmul.mubr.msk.f32.gmra.mrb[2].mxu0 %vm204_vm0, %v199_v6  ;;  %p819_p12 = pnand %p818_p11, %p948_p5  ;;  %p826_p2 = por %p825_p1, %p824_p0 }
  0x21   : > { %715 = vmatprep.mubr.msk.f32.mxu0 %vm204_vm0, %v200_v7  ;;  %389 = vperm.xlu1 %816, %v339_v20  }
  0x22   : > { %384 = vperm.xlu0 %815, %v338_v21   ;;  %p820_p13 = pneg %p819_p12 }
  0x24   : > { %716 = vmatmul.mubr.msk.f32.gmra.mrb[4].mxu0 %vm204_vm0, %v201_v8  ;;  %p827_p3 = pnand %p826_p2, %p820_p13 }
  0x25   : > { %730 = vmatprep.mubr.msk.f32.mxu0 %vm402_vm1, %v318_v9  ;;  %399 = vperm.xlu1 %816, %v341_v22  }
  0x26   : > { %394 = vperm.xlu0 %815, %v340_v23  }
  0x90   : > { %v355_v43 = vpop.permute.xlu1 %354 }
  0x91   : > { %v345_v44 = vpop.permute.xlu0 %344 }
  0x94   : > { %v360_v45 = vpop.permute.xlu1 %359 }
  0x95   : > { %v350_v46 = vpop.permute.xlu0 %349 }
  0x98   : > { %v370_v47 = vpop.permute.xlu1 %369 }
  0x99   : > { %v365_v48 = vpop.permute.xlu0 %364 }
  0x9c   : > { %v380_v49 = vpop.permute.xlu1 %379 }
  0x9d   : > { %v375_v50 = vpop.permute.xlu0 %374 }
  0xa0   : > { %v390_v1 = vpop.permute.xlu1 %389 }
  0xa1   : > { %v385_v4 = vpop.permute.xlu0 %384 }
  0xa4   : > { %v400_v9 = vpop.permute.xlu1 %399 }
  0xa5   : > { %v395_v11 = vpop.permute.xlu0 %394 }
  0xef   : > { %v711_v24 = vpop.f32.mrb[0].mxu0 }
  0xf0   : > { %v289_v25 = vpop.f32.mrb[1].mxu0 }
  0xf1   : > { %v752_v26 = vpack.c.bf16 %v711_v24, %v289_v25 }
  0xf3   : > { %v714_v27 = vpop.f32.mrb[2].mxu0  ;;  %753 = vmatprep.subr.bf16.mxu0 %v752_v26  ;;  %764 = vmatprep.subr.bf16.mxu1 %v752_v26 }
  0xf4   : > { %v299_v28 = vpop.f32.mrb[3].mxu0  ;;  %755 = vmatpush3.bf16.msra.mxu0 %v752_v26  ;;  %767 = vmatpush3.bf16.msra.mxu1 %v752_v26 }
  0xf5   : > { %v756_v29 = vpack.c.bf16 %v714_v27, %v299_v28 }
  0xf7   : > { %v717_v30 = vpop.f32.mrb[4].mxu0  ;;  %757 = vmatprep.subr.bf16.mxu0 %v756_v29  ;;  %765 = vmatprep.subr.bf16.mxu1 %v756_v29 }
  0xf8   : > { %v309_v31 = vpop.f32.mrb[5].mxu0  ;;  %759 = vmatpush3.bf16.msra.mxu0 %v756_v29  ;;  %768 = vmatpush3.bf16.msra.mxu1 %v756_v29 }
  0xf9   : > { %v760_v32 = vpack.c.bf16 %v717_v30, %v309_v31 }
  0xfb   : > { %761 = vmatprep.subr.bf16.mxu0 %v760_v32  ;;  %766 = vmatprep.subr.bf16.mxu1 %v760_v32 }
  0xfc   : > { %763 = vmatpush3.bf16.msra.mxu0 %v760_v32  ;;  %769 = vmatpush3.bf16.msra.mxu1 %v760_v32 }
  0xff   : > { %731 = vmatmul.mubr.msk.f32.vlgmr.msra.gmra.mrb[6].mxu0 %vm402_vm1, %v319_v33  ;;  %737 = vmatmul.mubr.msk.f32.vlgmr.msra.gmra.mrb[0].mxu1 %vm402_vm1, %v323_v34 }
 0x100   : > { %733 = vmatprep.mubr.msk.f32.mxu0 %vm402_vm1, %v320_v35  ;;  %739 = vmatprep.mubr.msk.f32.mxu1 %vm402_vm1, %v324_v36 }
 0x103   : > { %734 = vmatmul.mubr.msk.f32.gmra.mrb[8].mxu0 %vm402_vm1, %v321_v37  ;;  %740 = vmatmul.mubr.msk.f32.gmra.mrb[2].mxu1 %vm402_vm1, %v325_v38 }
 0x104   : > { %742 = vmatprep.mubr.msk.f32.mxu1 %vm402_vm1, %v326_v39 }
 0x107   : > { %743 = vmatmul.mubr.msk.f32.gmra.mrb[4].mxu1 %vm402_vm1, %v327_v40 }
 0x108   : > { %745 = vmatprep.mubr.msk.f32.mxu1 %vm402_vm1, %v328_v41 }
 0x10b   : > { %746 = vmatmul.mubr.msk.f32.gmra.mrb[6].mxu1 %vm402_vm1, %v329_v42 }
 0x1d2   : > { %v732_v51 = vpop.f32.mrb[6].mxu0  ;;  %v738_v52 = vpop.f32.mrb[0].mxu1 }
 0x1d3   : > { %v511_v53 = vadd.f32 %v732_v51, %v350_v46  ;;  %v531_v54 = vadd.f32 %v738_v52, %v370_v47  ;;  %v505_v55 = vpop.f32.mrb[7].mxu0  ;;  %v525_v56 = vpop.f32.mrb[1].mxu1 }
 0x1d4   : > { %v506_v57 = vadd.f32 %v505_v55, %v345_v44  ;;  %v526_v58 = vadd.f32 %v525_v56, %v365_v48 }
 0x1d5   : > { %566 = vst.msk [vmem:[%s1056_s9 + $0x8] sm:$0xff] %vm564_vm2, %v511_v53  ;;  %570 = vst.msk [vmem:[%s1056_s9 + $0x28] sm:$0xff] %vm564_vm2, %v531_v54 }
 0x1d6   : > { %565 = vst.msk [vmem:[%s1056_s9] sm:$0xff] %vm564_vm2, %v506_v57  ;;  %569 = vst.msk [vmem:[%s1056_s9 + $0x20] sm:$0xff] %vm564_vm2, %v526_v58  ;;  %v735_v59 = vpop.f32.mrb[8].mxu0  ;;  %v741_v60 = vpop.f32.mrb[2].mxu1 }
 0x1d7   : > { %v521_v61 = vadd.f32 %v735_v59, %v360_v45  ;;  %v541_v62 = vadd.f32 %v741_v60, %v380_v49  ;;  %v515_v63 = vpop.f32.mrb[9].mxu0  ;;  %v535_v0 = vpop.f32.mrb[3].mxu1 }
 0x1d8   : > { %v516_v2 = vadd.f32 %v515_v63, %v355_v43  ;;  %v536_v3 = vadd.f32 %v535_v0, %v375_v50 }
 0x1d9   : > { %568 = vst.msk [vmem:[%s1056_s9 + $0x18] sm:$0xff] %vm564_vm2, %v521_v61  ;;  %572 = vst.msk [vmem:[%s1056_s9 + $0x38] sm:$0xff] %vm564_vm2, %v541_v62 }
 0x1da   : > { %567 = vst.msk [vmem:[%s1056_s9 + $0x10] sm:$0xff] %vm564_vm2, %v516_v2  ;;  %571 = vst.msk [vmem:[%s1056_s9 + $0x30] sm:$0xff] %vm564_vm2, %v536_v3  ;;  %v744_v5 = vpop.f32.mrb[4].mxu1 }
 0x1db   : > { %v551_v6 = vadd.f32 %v744_v5, %v390_v1  ;;  %v545_v7 = vpop.f32.mrb[5].mxu1 }
 0x1dc   : > { %v546_v8 = vadd.f32 %v545_v7, %v385_v4 }
 0x1dd   : > { %574 = vst.msk [vmem:[%s1056_s9 + $0x48] sm:$0xff] %vm564_vm2, %v551_v6 }
 0x1de   : > { %573 = vst.msk [vmem:[%s1056_s9 + $0x40] sm:$0xff] %vm564_vm2, %v546_v8  ;;  %v747_v10 = vpop.f32.mrb[6].mxu1 }
 0x1df   : > { %v561_v12 = vadd.f32 %v747_v10, %v400_v9  ;;  %v555_v13 = vpop.f32.mrb[7].mxu1 }
 0x1e0   : > { %v556_v14 = vadd.f32 %v555_v13, %v395_v11 }
 0x1e1   : > { %576 = vst.msk [vmem:[%s1056_s9 + $0x58] sm:$0xff] %vm564_vm2, %v561_v12 }
 0x1e2   : > { %575 = vst.msk [vmem:[%s1056_s9 + $0x50] sm:$0xff] %vm564_vm2, %v556_v14 }
 0x1e3   : > { %830 = shalt.err (!%p827_p3)
}
 0x1e4   : > { %s831_s28 = scalar_lea.hbm %s1083_s14, 1536  ;;  %s835_s5 = scalar_lea.hbm %s1138_s4, 3072 }
 0x1e5   : > { %p832_p4 = scmp.ne.s32.totalorder %s1083_s14, %s831_s28  ;;  %p836_p9 = scmp.lt.u32.totalorder %s1083_s14, %s1138_s4 }
 0x1e6   : > { %p837_p10 = scmp.lt.u32.totalorder %s835_s5, %s831_s28  ;;  %p839_p12 = scmp.lt.u32.totalorder %s831_s28, %s1083_s14 }
 0x1e7   : > { %p833_p7 = pnand %p832_p4, %p948_p5 }
 0x1e8   : > { %p838_p11 = por %p837_p10, %p836_p9 }
 0x1e9   : > { %p834_p8 = pneg %p833_p7 }
 0x1ea   : > { %p840_p13 = por %p839_p12, %p838_p11 }
 0x1ec   : > { %p841_p0 = pnand %p840_p13, %p834_p8 }
 0x1ee   : > { %844 = shalt.err (!%p841_p0)
}
 0x1ef   : > { %s883_s8 = smov 128   ;;  %s884_s9 = smov 8  }
 0x1f0   : > { %773 = dma.vmem_to_hbm [thread:$0]  (%p948_p5), %s1085_s11, 1536, %s1083_s14, %s1093_s19, %s883_s8, %s883_s8, %s884_s9  }
 0x1f1 PF: > { %p779_p1 = scmp.ge.s32.totalorder %s879_s18, 2  ;;  %s606_s10 = sand.u32 1, %s867_s15  }
 0x1f2   : > { %s607_s12 = scalar_lea.sflag [#allocation3], %s606_s10 }
 0x1f3   : > { %p776_p2 = pnand %p779_p1, %p952_p6 }
 0x1f5   : > { %862 = dma.done.wait (!%p776_p2), %s607_s12, 1536  }
 0x1f6   : > { %864 = vsyncadd (!%p776_p2), %s607_s12, 4294965760  ;;  %p14_p3 = scmp.ge.s32.totalorder %s935_s21, 4   ;;  %s1141_s15 = smov %s871_s16 }
 0x1f7   : > { %s1142_s16 = smov %s875_s17  ;;  %s1143_s17 = smov %s946_s24 }
 0x1f8   : > { %s1144_s18 = smov %s935_s21  ;;  %16 = sbr.rel (!%p14_p3) target bundleno = 3 (0x3), region = 71 }
 0x1ff   :  { %612 = vsyncpa [#allocation3], 1 }
 0x200   :  { %614 = vsyncpa [#allocation3 + $0x1], 1 }

</bundles_post_ra>
